<compile_context>
chip_gen: v6e
topology: v6e:2x2x1
jax: 0.10.0
libtpu: 0.0.40
codegen_flags: <defaults>
</compile_context>

<pallas_src>
import functools

import jax
import jax.numpy as jnp
from jax.experimental import pallas as pl
from jax.experimental.pallas import tpu as pltpu


_MIN_BLOCK_BYTES = 1 * 1024 * 1024      # keep pipelined blocks >= ~1 MiB
_TILE_BYTES_TARGET = 2 * 1024 * 1024    # per-tile target for the two-pass path


def _round_up(a, b):
    return (a + b - 1) // b * b


def _cdiv(a, b):
    return (a + b - 1) // b


@functools.lru_cache(maxsize=None)
def _tpu_budgets():
    """(vmem_limit_bytes, fused_block_budget_bytes) derived from the chip."""
    cap = 0
    try:
        fn = getattr(pltpu, "get_tpu_info", None)
        if fn is not None:
            cap = int(getattr(fn(), "vmem_capacity_bytes", 0) or 0)
    except Exception:
        cap = 0
    if cap <= 0:
        cap = 64 * 1024 * 1024          # conservative fallback (v7x per-TC VMEM)
    cap = min(cap, 128 * 1024 * 1024)
    vmem_limit = (cap * 13) // 16       # v6e: ~104 MiB, v7x: ~52 MiB
    block_budget = (cap * 3) // 16      # v6e: ~24 MiB,  v7x: ~12 MiB
    return vmem_limit, block_budget


def _vmem_bytes_per_sample(C, S, itemsize):
    """VMEM footprint of one (1, C, S) slab after sublane/lane padding."""
    sublane_pack = max(1, 32 // itemsize)     # 8 for f32, 16 for bf16, 32 for int8
    return _round_up(C, sublane_pack) * _round_up(S, 128) * itemsize


# ----------------------------------------------------------------------------
# Fused single-pass kernel: pool + gate + scale for a (TB, C, S) batch block.
# ----------------------------------------------------------------------------
def _se3d_fused_kernel(x_ref, w1t_ref, w2t_ref, o_ref, *, inv_s):
    # x_ref:   (TB, C, S)  native dtype (no full-tile f32 upcast)
    # w1t_ref: (C, Cr)     fc1 weight, pre-transposed (Conv3d 1x1x1 == matmul)
    # w2t_ref: (Cr, C)     fc2 weight, pre-transposed
    # o_ref:   (TB, C, S)
    x = x_ref[...]

    # Squeeze: f32-accumulated sum over the full (logical) spatial axis.
    pooled = jnp.sum(x, axis=2, dtype=jnp.float32) * inv_s            # (TB, C)

    # Excite: fc1 -> ReLU -> fc2 -> sigmoid (tiny matmuls, f32 accumulation).
    h = jnp.maximum(
        jnp.dot(pooled, w1t_ref[...].astype(jnp.float32),
                preferred_element_type=jnp.float32), 0.0)             # (TB, Cr)
    gate = jax.nn.sigmoid(
        jnp.dot(h, w2t_ref[...].astype(jnp.float32),
                preferred_element_type=jnp.float32))                  # (TB, C)

    # Scale in the native dtype.
    o_ref[...] = x * gate.astype(o_ref.dtype)[:, :, None]


@jax.jit
def _se3d_fused(x, w_fc1, w_fc2):
    N, C, D, H, W = x.shape
    Cr = w_fc1.shape[0]
    S = D * H * W
    itemsize = jnp.dtype(x.dtype).itemsize
    vmem_limit, block_budget = _tpu_budgets()
    per_sample = _vmem_bytes_per_sample(C, S, itemsize)

    # Batch block: >= 4 grid steps when N allows it, blocks >= ~1 MiB, and the
    # block (double-buffered in + out) stays inside the per-block VMEM budget.
    tb_cap = max(1, block_budget // per_sample)
    tb_floor = max(1, _cdiv(_MIN_BLOCK_BYTES, per_sample))
    tb_target = max(1, N // 4)
    TB = max(1, min(tb_cap, N, max(tb_target, tb_floor)))

    x_flat = x.reshape(N, C, S)            # free: NCDHW is row-major contiguous
    w1t = jnp.transpose(w_fc1)             # (C, Cr)
    w2t = jnp.transpose(w_fc2)             # (Cr, C)

    out = pl.pallas_call(
        functools.partial(_se3d_fused_kernel, inv_s=1.0 / S),
        out_shape=jax.ShapeDtypeStruct((N, C, S), x.dtype),
        grid=(_cdiv(N, TB),),              # ragged tail block handled by Pallas
        in_specs=[
            pl.BlockSpec((TB, C, S), lambda i: (i, 0, 0)),
            pl.BlockSpec((C, Cr), lambda i: (0, 0)),   # constant index -> no re-DMA
            pl.BlockSpec((Cr, C), lambda i: (0, 0)),
        ],
        out_specs=pl.BlockSpec((TB, C, S), lambda i: (i, 0, 0)),
        compiler_params=pltpu.CompilerParams(
            dimension_semantics=("parallel",),
            vmem_limit_bytes=vmem_limit),
    )(x_flat, w1t, w2t)

    return out.reshape(N, C, D, H, W)


# ----------------------------------------------------------------------------
# Two-pass fallback for large C*S:
#   pass 1 = per-(sample, spatial-tile) partial sums on a fully parallel grid
#   gate   = tiny fc1 -> ReLU -> fc2 -> sigmoid in plain JAX
#   pass 2 = streaming scale with lane-dense (C, TS) tiles
# ----------------------------------------------------------------------------
def _se3d_pool_kernel(x_ref, psum_ref, *, s_total, ts):
    # x_ref: (1, C, TS) native dtype; psum_ref: (1, 1, C, 1) f32 partial sum.
    s = pl.program_id(1)
    x = x_ref[...]
    # Mask the ragged tail tile: out-of-bounds lane contents are undefined.
    lane = jax.lax.broadcasted_iota(jnp.int32, x.shape, 2) + s * ts
    xm = jnp.where(lane < s_total, x, jnp.zeros_like(x))
    psum_ref[...] = jnp.sum(xm, axis=2, keepdims=True, dtype=jnp.float32)[None]


def _se3d_scale_kernel(x_ref, g_ref, o_ref):
    # x_ref: (1, C, TS); g_ref: (1, C, 1) same dtype as x; o_ref: (1, C, TS)
    # Tail-tile OOB writes are dropped by Pallas partial-block semantics.
    o_ref[...] = x_ref[...] * g_ref[...]


@jax.jit
def _se3d_two_pass(x, w_fc1, w_fc2):
    N, C, D, H, W = x.shape
    S = D * H * W
    itemsize = jnp.dtype(x.dtype).itemsize
    vmem_limit, _ = _tpu_budgets()
    c_pad = _round_up(C, max(1, 32 // itemsize))

    # Spatial tile: multiple of 128 lanes, ~2 MiB; no HBM padding of S.
    ts_budget = max(128, (_TILE_BYTES_TARGET // (c_pad * itemsize)) // 128 * 128)
    TS = int(min(_round_up(S, 128), ts_budget))
    if TS >= S:
        TS = S                              # single tile: use the full (legal) dim
    n_s = _cdiv(S, TS)

    x_flat = x.reshape(N, C, S)

    # Pass 1: partial per-channel sums, fully parallel (N, n_s) grid so both
    # v7x TensorCores get work even for N == 1.
    psums = pl.pallas_call(
        functools.partial(_se3d_pool_kernel, s_total=S, ts=TS),
        out_shape=jax.ShapeDtypeStruct((n_s, N, C, 1), jnp.float32),
        grid=(N, n_s),
        in_specs=[pl.BlockSpec((1, C, TS), lambda n, s: (n, 0, s))],
        out_specs=pl.BlockSpec((1, 1, C, 1), lambda n, s: (s, n, 0, 0)),
        compiler_params=pltpu.CompilerParams(
            dimension_semantics=("parallel", "parallel"),
            vmem_limit_bytes=vmem_limit),
    )(x_flat)

    # Tiny gate (fc1 -> ReLU -> fc2 -> sigmoid) in plain JAX.
    pooled = jnp.sum(psums[..., 0], axis=0) * (1.0 / S)                # (N, C) f32
    h = jnp.maximum(pooled @ jnp.transpose(w_fc1).astype(jnp.float32), 0.0)
    gate = jax.nn.sigmoid(h @ jnp.transpose(w_fc2).astype(jnp.float32))
    gate = gate.astype(x.dtype)[:, :, None]                            # (N, C, 1)

    # Pass 2: streaming scale with lane-dense (C, TS) tiles (no pad, no slice).
    out = pl.pallas_call(
        _se3d_scale_kernel,
        out_shape=jax.ShapeDtypeStruct((N, C, S), x.dtype),
        grid=(N, n_s),
        in_specs=[pl.BlockSpec((1, C, TS), lambda n, s: (n, 0, s)),
                  pl.BlockSpec((1, C, 1), lambda n, s: (n, 0, 0))],
        out_specs=pl.BlockSpec((1, C, TS), lambda n, s: (n, 0, s)),
        compiler_params=pltpu.CompilerParams(
            dimension_semantics=("parallel", "parallel"),
            vmem_limit_bytes=vmem_limit),
    )(x_flat, gate)

    return out.reshape(N, C, D, H, W)


# ----------------------------------------------------------------------------
# Public wrapper: fused path when a (1, C, S) slab fits the per-block VMEM
# budget (2x HBM traffic), otherwise the two-pass tiled path (3x traffic).
# ----------------------------------------------------------------------------
def se_module_3d(x, w_fc1, w_fc2, force_path=None):
    """x: (N, C, D, H, W); w_fc1: (Cr, C); w_fc2: (C, Cr)."""
    N, C, D, H, W = x.shape
    S = D * H * W
    itemsize = jnp.dtype(x.dtype).itemsize
    _, block_budget = _tpu_budgets()
    per_sample = _vmem_bytes_per_sample(C, S, itemsize)
    if force_path == "two_pass":
        return _se3d_two_pass(x, w_fc1, w_fc2)
    if force_path == "fused" or per_sample <= block_budget:
        return _se3d_fused(x, w_fc1, w_fc2)
    return _se3d_two_pass(x, w_fc1, w_fc2)


def se_module_3d_ref(x, w_fc1, w_fc2):
    """Plain-JAX reference matching the PyTorch forward."""
    pooled = jnp.mean(x, axis=(2, 3, 4))                      # (N, C)
    h = jnp.maximum(pooled @ w_fc1.T, 0.0)                    # (N, Cr)
    s = jax.nn.sigmoid(h @ w_fc2.T)                           # (N, C)
    return x * s[:, :, None, None, None]


if __name__ == "__main__":
    # Small shapes consistent with the module: channels=8, reduction=4.
    # Spatial size 3*6*10 = 180 deliberately NOT a multiple of 128 to exercise
    # the no-pad / full-S block path.
    N, C, D, H, W = 2, 8, 3, 6, 10
    reduction = 4
    Cr = C // reduction

    key = jax.random.PRNGKey(0)
    kx, k1, k2 = jax.random.split(key, 3)

    x = jax.random.normal(kx, (N, C, D, H, W), dtype=jnp.float32)
    # Conv3d 1x1x1, bias=False:
    #   fc1.weight: (C//r, C, 1, 1, 1) -> (Cr, C)
    #   fc2.weight: (C, C//r, 1, 1, 1) -> (C, Cr)
    w_fc1 = jax.random.normal(k1, (Cr, C), dtype=jnp.float32) * 0.1
    w_fc2 = jax.random.normal(k2, (C, Cr), dtype=jnp.float32) * 0.1

    ref = se_module_3d_ref(x, w_fc1, w_fc2)

    # Default (fused) path.
    out = jax.block_until_ready(se_module_3d(x, w_fc1, w_fc2))
    assert out.shape == (N, C, D, H, W)
    assert jnp.allclose(out, ref, atol=1e-5, rtol=1e-5), "fused path mismatch"

    # Two-pass fallback path (exercised here for coverage at small shapes).
    out2 = jax.block_until_ready(se_module_3d(x, w_fc1, w_fc2, force_path="two_pass"))
    assert jnp.allclose(out2, ref, atol=1e-5, rtol=1e-5), "two-pass path mismatch"

    print("KERNEL_OK")
</pallas_src>

<mosaic_0001>
module attributes {stable_mosaic.version = 11 : i64} {
  func.func @_se3d_fused_kernel(%arg0: i32, %arg1: memref<2x8x180xf32, #tpu.memory_space<vmem>>, %arg2: memref<8x2xf32, #tpu.memory_space<vmem>>, %arg3: memref<2x8xf32, #tpu.memory_space<vmem>>, %arg4: memref<2x8x180xf32, #tpu.memory_space<vmem>>) attributes {dimension_semantics = [#tpu.dimension_semantics<parallel>], iteration_bounds = array<i64: 1>, scalar_prefetch = 0 : i64, scratch_operands = 0 : i64, tpu.core_type = #tpu.core_type<tc>, window_params = [{transform_indices = @transform_0, window_bounds = array<i64: 2, 8, 180>}, {pipeline_mode = #tpu.pipeline_mode<synchronous>, transform_indices = @transform_1, window_bounds = array<i64: 8, 2>}, {pipeline_mode = #tpu.pipeline_mode<synchronous>, transform_indices = @transform_2, window_bounds = array<i64: 2, 8>}, {transform_indices = @transform_3, window_bounds = array<i64: 2, 8, 180>}]} {
    %c0 = arith.constant 0 : index
    %c0_0 = arith.constant 0 : index
    %c0_1 = arith.constant 0 : index
    %0 = vector.load %arg1[%c0, %c0_0, %c0_1] : memref<2x8x180xf32, #tpu.memory_space<vmem>>, vector<2x8x180xf32>
    %cst = arith.constant dense<0.000000e+00> : vector<2x8xf32>
    %1 = vector.multi_reduction <add>, %0, %cst [2] : vector<2x8x180xf32> to vector<2x8xf32>
    %cst_2 = arith.constant 0.00555555569 : f32
    %2 = vector.broadcast %cst_2 : f32 to vector<2x8xf32>
    %3 = arith.mulf %1, %2 : vector<2x8xf32>
    %c0_3 = arith.constant 0 : index
    %c0_4 = arith.constant 0 : index
    %4 = vector.load %arg2[%c0_3, %c0_4] : memref<8x2xf32, #tpu.memory_space<vmem>>, vector<8x2xf32>
    %cst_5 = arith.constant dense<0.000000e+00> : vector<2x2xf32>
    %5 = tpu.matmul %3, %4, %cst_5 {dimension_numbers = #tpu.dot_dimension_numbers<[1], [0], [0], [1], [0, 0, 1, 1], [], []>} : vector<2x8xf32>, vector<8x2xf32>, vector<2x2xf32> -> vector<2x2xf32>
    %cst_6 = arith.constant 0.000000e+00 : f32
    %6 = vector.broadcast %cst_6 : f32 to vector<2x2xf32>
    %7 = arith.maximumf %5, %6 : vector<2x2xf32>
    %c0_7 = arith.constant 0 : index
    %c0_8 = arith.constant 0 : index
    %8 = vector.load %arg3[%c0_7, %c0_8] : memref<2x8xf32, #tpu.memory_space<vmem>>, vector<2x8xf32>
    %cst_9 = arith.constant dense<0.000000e+00> : vector<2x8xf32>
    %9 = tpu.matmul %7, %8, %cst_9 {dimension_numbers = #tpu.dot_dimension_numbers<[1], [0], [0], [1], [0, 0, 1, 1], [], []>} : vector<2x2xf32>, vector<2x8xf32>, vector<2x8xf32> -> vector<2x8xf32>
    %10 = arith.negf %9 : vector<2x8xf32>
    %11 = math.exp %10 : vector<2x8xf32>
    %cst_10 = arith.constant 1.000000e+00 : f32
    %12 = vector.broadcast %cst_10 : f32 to vector<2x8xf32>
    %13 = arith.addf %12, %11 : vector<2x8xf32>
    %14 = arith.divf %12, %13 : vector<2x8xf32>
    %15 = vector.shape_cast %14 : vector<2x8xf32> to vector<2x8x1xf32>
    %16 = vector.broadcast %15 : vector<2x8x1xf32> to vector<2x8x180xf32>
    %17 = arith.mulf %0, %16 : vector<2x8x180xf32>
    %c0_11 = arith.constant 0 : index
    %c0_12 = arith.constant 0 : index
    %c0_13 = arith.constant 0 : index
    %18 = vector.load %arg4[%c0_11, %c0_12, %c0_13] : memref<2x8x180xf32, #tpu.memory_space<vmem>>, vector<2x8x180xf32>
    tpu.vector_store %arg4[%c0_11, %c0_12, %c0_13], %17 {strides = array<i32>} : memref<2x8x180xf32, #tpu.memory_space<vmem>>, vector<2x8x180xf32>,
    return
  }
  func.func @transform_0(%arg0: i32) -> (i32, i32, i32) {
    %c0_i32 = arith.constant 0 : i32
    %c0_i32_0 = arith.constant 0 : i32
    %c0_i32_1 = arith.constant 0 : i32
    return %arg0, %c0_i32, %c0_i32_0 : i32, i32, i32
  }
  func.func @transform_1(%arg0: i32) -> (i32, i32) {
    %c0_i32 = arith.constant 0 : i32
    %c0_i32_0 = arith.constant 0 : i32
    %c0_i32_1 = arith.constant 0 : i32
    return %c0_i32, %c0_i32_0 : i32, i32
  }
  func.func @transform_2(%arg0: i32) -> (i32, i32) {
    %c0_i32 = arith.constant 0 : i32
    %c0_i32_0 = arith.constant 0 : i32
    %c0_i32_1 = arith.constant 0 : i32
    return %c0_i32, %c0_i32_0 : i32, i32
  }
  func.func @transform_3(%arg0: i32) -> (i32, i32, i32) {
    %c0_i32 = arith.constant 0 : i32
    %c0_i32_0 = arith.constant 0 : i32
    %c0_i32_1 = arith.constant 0 : i32
    return %arg0, %c0_i32, %c0_i32_0 : i32, i32, i32
  }
}

</mosaic_0001>

<bundles_post_ra>
// kernel: _se3d_fused.1
= control target key start
LH: loop header
LB: loop body
LE: loop exit
PB: predicated region body
PF: predicated region fallthrough
CT: control target
= control target key end

     0   :  { %vm18_vm0 = vcmask 424960   ;;  %v253_v8 = vmov 0.0   ;;  %vm254_vm1 = vmmov 0   ;;  %v32_v10 = vlaneseq  ;;  %s309_s0 = inlined_call_operand.vmem [shape: f32[2,8,180], index: 0, kind: input, shape index: {}]   ;;  %s310_s1 = inlined_call_operand.vmem [shape: f32[8,2], index: 1, kind: input, shape index: {}]   ;;  %s311_s2 = inlined_call_operand.vmem [shape: f32[2,8], index: 2, kind: input, shape index: {}]   ;;  %s312_s3 = inlined_call_operand.vmem [shape: f32[2,8,180], index: 3, kind: output, shape index: {}]  }
   0x1   :  { %v14_v0 = vld [vmem:[%s309_s0] sm:$0xff]  ;;  %v15_v1 = vld [vmem:[%s309_s0 + $0x8] sm:$0xff]  ;;  %v16_v3 = vld [vmem:[%s309_s0 + $0x10] sm:$0xff]  ;;  %237 = vmatprep.subr.mxu0 %v253_v8  ;;  %239 = vmatprep.mubr.msk.f32.mxu0 %vm254_vm1, %v253_v8  ;;  %vm42_vm2 = vcmask 1041409   ;;  %vm44_vm3 = vcmask 64512   ;;  %vm123_vm4 = vcmask 1041408  }
   0x2   :  { %v19_v2 = vsel %vm18_vm0, %v15_v1, 0.0  ;;  %v17_v4 = vld [vmem:[%s309_s0 + $0x18] sm:$0xff]  ;;  %v29_v9 = vld [vmem:[%s310_s1] sm:$0xff]  ;;  %242 = vmatprep.subr.mxu1 %v253_v8  ;;  %244 = vmatprep.mubr.msk.f32.mxu1 %vm254_vm1, %v253_v8  ;;  %v33_v11 = vand.u32 127, %v32_v10  ;;  %v35_v12 = vshrl.u32 %v32_v10, 7  ;;  %vm119_vm5 = vcmask 15360  }
   0x3   :  { %v20_v5 = vadd.f32 %v19_v2, %v14_v0  ;;  %v23_v6 = vsel %vm18_vm0, %v17_v4, 0.0  ;;  %238 = vmatpush3.msra.mxu0 %v29_v9  ;;  %v118_v21 = vld [vmem:[%s311_s2] sm:$0x3] }
   0x4   :  { %v24_v7 = vadd.f32 %v23_v6, %v16_v3  ;;  %v36_v14 = vsub.s32 %v33_v11, %v35_v12  ;;  %243 = vmatpush3.msk.msra.mxu1 %vm123_vm4, %v118_v21  ;;  %v205_v30 = vsub.s32 0, %v35_v12  ;;  %v212_v33 = vsub.s32 1, %v35_v12 }
   0x5   :  { %21 = vadd.xlane.f32.xlu0 %v20_v5 }
   0x9   :  { %25 = vadd.xlane.f32.xlu0 %v24_v7 }
  0x8e   :  { %v22_v13 = vpop.xlane.xlu0 %21 }
  0x8f   :  { %v27_v15 = vmul.f32 0.0055555557, %v22_v13 }
  0x91   :  { %v37_v18 = vrot.slane %v27_v15, %v36_v14 }
  0x92   :  { %v26_v16 = vpop.xlane.xlu0 %25 }
  0x93   :  { %v28_v17 = vmul.f32 0.0055555557, %v26_v16 }
  0x95   :  { %v41_v19 = vrot.slane %v28_v17, %v36_v14 }
  0x97   :  { %v43_v20 = vsel %vm42_vm2, %v41_v19, %v37_v18 }
  0x98   :  { %240 = vmatmul.mubr.msk.f32.vlgmr.msra.gmra.mxu0 %vm44_vm3, %v43_v20 }
 0x158   :  { %v113_v22 = vpop.f32.mrf.mxu0 }
 0x159   :  { %v117_v23 = vmax.f32 %v113_v22, 0.0 }
 0x15a   :  { %v241_v24 = vpop.f32.mrf.mxu0 }
 0x15b   :  { %245 = vmatmul.mubr.msk.f32.vlgmr.msra.gmra.mxu1 %vm119_vm5, %v117_v23 }
 0x21b   :  { %v193_v25 = vpop.f32.mrf.mxu1 }
 0x21c   :  { %v232_v26 = vmul.f32 -1.442695, %v193_v25 }
 0x21d   :  { %v246_v27 = vpop.f32.mrf.mxu1 }
 0x21e   :  { %249 = vpow2.f32 %v232_v26 }
 0x22b   :  { %v250_v28 = vpop.eup %249 }
 0x22c   :  { %v200_v29 = vadd.f32 1.0, %v250_v28 }
 0x22e   :  { %251 = vrcp.f32 %v200_v29 }
 0x23b   :  { %v252_v31 = vpop.eup %251 }
 0x23c   :  { %v206_v32 = vrot.slane %v252_v31, %v205_v30  ;;  %v213_v34 = vrot.slane %v252_v31, %v212_v33 }
 0x23e   :  { %208 = vbcast.lane.b32.xlu1 %v206_v32, 256 }
 0x242   :  { %215 = vbcast.lane.b32.xlu1 %v213_v34, 256 }
 0x2b0   :  { %v209_v35 = vpop.permute.xlu1 %208 }
 0x2b1   :  { %v217_v36 = vmul.f32 %v209_v35, %v14_v0  ;;  %v218_v37 = vmul.f32 %v209_v35, %v15_v1 }
 0x2b3   :  { %221 = vst [vmem:[%s312_s3] sm:$0xff] %v217_v36  ;;  %222 = vst.msk [vmem:[%s312_s3 + $0x8] sm:$0xff] %vm18_vm0, %v218_v37 }
 0x2b4   :  { %v216_v38 = vpop.permute.xlu1 %215 }
 0x2b5   :  { %v219_v39 = vmul.f32 %v216_v38, %v16_v3  ;;  %v220_v40 = vmul.f32 %v216_v38, %v17_v4 }
 0x2b7   :  { %223 = vst [vmem:[%s312_s3 + $0x10] sm:$0xff] %v219_v39  ;;  %224 = vst.msk [vmem:[%s312_s3 + $0x18] sm:$0xff] %vm18_vm0, %v220_v40 }

</bundles_post_ra>
